<compile_context>
chip_gen: v7x
topology: tpu7x:2x2x1
jax: 0.10.0
libtpu: 0.0.40
codegen_flags: <defaults>
</compile_context>

<pallas_src>
import functools

import jax
import jax.numpy as jnp
from jax import lax
from jax.experimental import pallas as pl
from jax.experimental.pallas import tpu as pltpu


# ----------------------------- kernel 1: style FC -----------------------------

def _style_kernel(latent_ref, w_ref, b_ref, scale_ref, shift_ref,
                  *, w_lrmul, b_lrmul, c):
    # latent: (N, L), w: (2C, L), b: (1, 2C)
    latent = latent_ref[...]
    w = w_ref[...]
    b = b_ref[...]
    # F.linear(latent, W * w_lrmul, bias * b_lrmul) without materializing W.T:
    # contract latent dim 1 against w dim 1, scale the small (N, 2C) result.
    style = lax.dot_general(
        latent, w, dimension_numbers=(((1,), (1,)), ((), ())),
        preferred_element_type=jnp.float32) * w_lrmul
    style = style + b * b_lrmul                         # (N, 2C)
    style = jnp.where(style >= 0, style, 0.2 * style)   # leaky_relu(0.2)
    scale_ref[...] = style[:, :c] + 1.0                 # fold the +1.0 here
    shift_ref[...] = style[:, c:2 * c]


def _compute_style(latent, weight, bias, w_lrmul, b_lrmul, c):
    n = latent.shape[0]
    kernel = functools.partial(_style_kernel, w_lrmul=w_lrmul,
                               b_lrmul=b_lrmul, c=c)
    return pl.pallas_call(
        kernel,
        out_shape=(jax.ShapeDtypeStruct((n, c), jnp.float32),
                   jax.ShapeDtypeStruct((n, c), jnp.float32)),
        in_specs=[pl.BlockSpec(memory_space=pltpu.MemorySpace.VMEM)] * 3,
        out_specs=(pl.BlockSpec(memory_space=pltpu.MemorySpace.VMEM),
                   pl.BlockSpec(memory_space=pltpu.MemorySpace.VMEM)),
    )(latent, weight, bias)


# ------------------------- kernel 2: modulation stream -------------------------

def _modulate_kernel(x_ref, scale_ref, shift_ref, out_ref):
    # x: (TILE_R, H*W), scale/shift: (TILE_R, 1) -> pure lane broadcast.
    # scale/shift are f32, so the modulation math stays in f32 even if x is
    # lower precision; cast back only at the store.
    out_ref[...] = (x_ref[...] * scale_ref[...] + shift_ref[...]).astype(out_ref.dtype)


def _pick_tile_rows(rows, lanes, itemsize, target_bytes=2 * 1024 * 1024):
    """Largest multiple-of-8 row count whose (rows, lanes) tile is ~2 MiB.

    ~2 MiB tiles keep 2x(input) + 2x(output) double buffers at ~8-9 MiB:
    inside v5e's 16 MiB scoped-VMEM default and v7x's 32 MiB (of 64 MiB
    physical), while staying large enough (>=512 KiB) to amortize the
    ~0.35 us per-grid-step overhead against HBM bandwidth on every generation.
    """
    max_rows = max(8, (target_bytes // max(1, lanes * itemsize)) // 8 * 8)
    if rows <= max_rows:
        return rows          # full row extent in one block (always legal)
    return max_rows          # multiple of 8; a partial last block is handled by Pallas


def apply_style(x, latent, weight, bias, w_lrmul, b_lrmul):
    """x: (N, C, H, W), latent: (N, L), weight: (2C, L), bias: (1, 2C)."""
    N, C, H, W = x.shape
    rows, lanes = N * C, H * W

    # --- style FC (tiny, one shot, in Pallas) ---
    scale, shift = _compute_style(latent, weight, bias, w_lrmul, b_lrmul, C)
    scale2d = scale.reshape(rows, 1)      # layout plumbing on a tiny (N, C) array
    shift2d = shift.reshape(rows, 1)

    # --- streaming modulation over row tiles ---
    x2d = x.reshape(rows, lanes)          # lane dim = H*W -> lane-dense stores
    tile_r = _pick_tile_rows(rows, lanes, x2d.dtype.itemsize)
    grid = (pl.cdiv(rows, tile_r),)

    out2d = pl.pallas_call(
        _modulate_kernel,
        out_shape=jax.ShapeDtypeStruct((rows, lanes), x.dtype),
        grid=grid,
        in_specs=[
            pl.BlockSpec((tile_r, lanes), lambda i: (i, 0)),
            pl.BlockSpec((tile_r, 1), lambda i: (i, 0)),
            pl.BlockSpec((tile_r, 1), lambda i: (i, 0)),
        ],
        out_specs=pl.BlockSpec((tile_r, lanes), lambda i: (i, 0)),
        compiler_params=pltpu.CompilerParams(
            dimension_semantics=("parallel",)),   # v7x: shard rows across 2 TCs
    )(x2d, scale2d, shift2d)

    return out2d.reshape(N, C, H, W)


# --------------------------------- reference -----------------------------------

def apply_style_ref(x, latent, weight, bias, w_lrmul, b_lrmul):
    """Pure-JAX reference mirroring the PyTorch module."""
    style = latent @ (weight * w_lrmul).T + bias * b_lrmul
    style = jnp.where(style >= 0, style, 0.2 * style)
    N, C = x.shape[0], x.shape[1]
    style = style.reshape(N, 2, C, 1, 1)
    return x * (style[:, 0] + 1.0) + style[:, 1]


if __name__ == "__main__":
    # Small shapes: batch=2, channels=4, spatial=16, latent_size=32.
    N, C, H, W = 2, 4, 16, 16
    latent_size = 32
    use_wscale = True
    gain = 1.0
    lrmul = 1.0

    # Deterministic parameter init (matches FC.__init__ formulas).
    he_std = gain * latent_size ** (-0.5)
    if use_wscale:
        init_std = 1.0 / lrmul
        w_lrmul = he_std * lrmul
    else:
        init_std = he_std / lrmul
        w_lrmul = lrmul
    b_lrmul = lrmul

    key = jax.random.PRNGKey(0)
    kx, kl, kw = jax.random.split(key, 3)
    x = jax.random.normal(kx, (N, C, H, W), dtype=jnp.float32)
    latent = jax.random.normal(kl, (N, latent_size), dtype=jnp.float32)
    weight = jax.random.normal(kw, (2 * C, latent_size), dtype=jnp.float32) * init_std
    bias = jnp.zeros((1, 2 * C), dtype=jnp.float32)

    out = apply_style(x, latent, weight, bias, w_lrmul, b_lrmul)
    out = jax.block_until_ready(out)

    ref = apply_style_ref(x, latent, weight, bias, w_lrmul, b_lrmul)
    assert out.shape == (N, C, H, W)
    assert jnp.allclose(out, ref, atol=1e-5, rtol=1e-5), "mismatch vs reference"

    print("KERNEL_OK")
</pallas_src>

<mosaic_0001>
module attributes {stable_mosaic.version = 11 : i64} {
  func.func @_style_kernel(%arg0: memref<2x32xf32, #tpu.memory_space<vmem>>, %arg1: memref<8x32xf32, #tpu.memory_space<vmem>>, %arg2: memref<1x8xf32, #tpu.memory_space<vmem>>, %arg3: memref<2x4xf32, #tpu.memory_space<vmem>>, %arg4: memref<2x4xf32, #tpu.memory_space<vmem>>) attributes {dimension_semantics = [], scalar_prefetch = 0 : i64, scratch_operands = 0 : i64, tpu.core_type = #tpu.core_type<tc>} {
    %c0 = arith.constant 0 : index
    %c0_0 = arith.constant 0 : index
    %0 = vector.load %arg0[%c0, %c0_0] : memref<2x32xf32, #tpu.memory_space<vmem>>, vector<2x32xf32>
    %c0_1 = arith.constant 0 : index
    %c0_2 = arith.constant 0 : index
    %1 = vector.load %arg1[%c0_1, %c0_2] : memref<8x32xf32, #tpu.memory_space<vmem>>, vector<8x32xf32>
    %c0_3 = arith.constant 0 : index
    %c0_4 = arith.constant 0 : index
    %2 = vector.load %arg2[%c0_3, %c0_4] : memref<1x8xf32, #tpu.memory_space<vmem>>, vector<1x8xf32>
    %cst = arith.constant dense<0.000000e+00> : vector<2x8xf32>
    %3 = tpu.matmul %0, %1, %cst {dimension_numbers = #tpu.dot_dimension_numbers<[1], [1], [0], [0], [0, 0, 1, 0], [], []>} : vector<2x32xf32>, vector<8x32xf32>, vector<2x8xf32> -> vector<2x8xf32>
    %cst_5 = arith.constant 0.176776692 : f32
    %4 = vector.broadcast %cst_5 : f32 to vector<2x8xf32>
    %5 = arith.mulf %3, %4 : vector<2x8xf32>
    %cst_6 = arith.constant 1.000000e+00 : f32
    %6 = vector.broadcast %cst_6 : f32 to vector<1x8xf32>
    %7 = arith.mulf %2, %6 : vector<1x8xf32>
    %8 = vector.broadcast %7 : vector<1x8xf32> to vector<2x8xf32>
    %9 = arith.addf %5, %8 : vector<2x8xf32>
    %cst_7 = arith.constant 0.000000e+00 : f32
    %10 = vector.broadcast %cst_7 : f32 to vector<2x8xf32>
    %11 = arith.cmpf oge, %9, %10 : vector<2x8xf32>
    %cst_8 = arith.constant 2.000000e-01 : f32
    %12 = vector.broadcast %cst_8 : f32 to vector<2x8xf32>
    %13 = arith.mulf %12, %9 : vector<2x8xf32>
    %14 = arith.select %11, %9, %13 : vector<2x8xi1>, vector<2x8xf32>
    %15 = vector.extract_strided_slice %14 {offsets = [0, 0], sizes = [2, 4], strides = [1, 1]} : vector<2x8xf32> to vector<2x4xf32>
    %cst_9 = arith.constant 1.000000e+00 : f32
    %16 = vector.broadcast %cst_9 : f32 to vector<2x4xf32>
    %17 = arith.addf %15, %16 : vector<2x4xf32>
    %c0_10 = arith.constant 0 : index
    %c0_11 = arith.constant 0 : index
    %18 = vector.load %arg3[%c0_10, %c0_11] : memref<2x4xf32, #tpu.memory_space<vmem>>, vector<2x4xf32>
    tpu.vector_store %arg3[%c0_10, %c0_11], %17 {strides = array<i32>} : memref<2x4xf32, #tpu.memory_space<vmem>>, vector<2x4xf32>,
    %19 = vector.extract_strided_slice %14 {offsets = [0, 4], sizes = [2, 4], strides = [1, 1]} : vector<2x8xf32> to vector<2x4xf32>
    %c0_12 = arith.constant 0 : index
    %c0_13 = arith.constant 0 : index
    %20 = vector.load %arg4[%c0_12, %c0_13] : memref<2x4xf32, #tpu.memory_space<vmem>>, vector<2x4xf32>
    tpu.vector_store %arg4[%c0_12, %c0_13], %19 {strides = array<i32>} : memref<2x4xf32, #tpu.memory_space<vmem>>, vector<2x4xf32>,
    return
  }
}

</mosaic_0001>

<bundles_post_ra>
// kernel: tpu_custom_call.1
= control target key start
LH: loop header
LB: loop body
LE: loop exit
PB: predicated region body
PF: predicated region fallthrough
CT: control target
= control target key end

     0   :  { %10 = vsyncpa [#allocation3], 0  ;;  %s369_s0 = inlined_call_operand.hbm [shape: f32[2,32], index: 0, kind: input, shape index: {}]   ;;  %s370_s1 = inlined_call_operand.hbm [shape: f32[8,32], index: 1, kind: input, shape index: {}]   ;;  %s371_s2 = inlined_call_operand.vmem [shape: f32[1,8], index: 2, kind: input, shape index: {}]   ;;  %s372_s3 = inlined_call_operand.hbm [shape: f32[2,4], index: 3, kind: output, shape index: {0}]   ;;  %s373_s4 = inlined_call_operand.hbm [shape: f32[2,4], index: 4, kind: output, shape index: {1}]  }
   0x1   :  { %11 = vsyncpa [#allocation6], 0 }
   0x2   :  { %12 = vsyncpa [#allocation4], 0 }
   0x3   :  { %13 = vsyncpa [#allocation9], 0  ;;  %s284_s15 = smov [#allocation2]   ;;  %s285_s17 = smov [#allocation5]  }
   0x4   :  { %s20_s16 = sshll.u32 %s284_s15, 4  ;;  %s30_s18 = sshll.u32 %s285_s17, 4  ;;  %s21_s16 = int_to_ptr.vmem [resolvable:$true] %s20_s16  ;;  %s31_s18 = int_to_ptr.vmem [resolvable:$true] %s30_s18 }
   0x5   :  { %s188_s21 = scalar_lea.hbm %s369_s0, 32 }
   0x6   :  { %p189_p0 = scmp.ne.s32.totalorder %s369_s0, %s188_s21  ;;  %p192_p1 = scmp.lt.u32.totalorder %s188_s21, %s369_s0 }
   0x8   :  { %p194_p2 = pnand %p192_p1, %p189_p0 }
   0xa   :  { %197 = shalt.err (!%p194_p2)
}
   0xb   :  { %s198_s26 = scalar_lea.vmem %s21_s16, 32  ;;  %p203_p4 = scmp.lt.s32.totalorder %s21_s16, %s21_s16 }
   0xc   :  { %p199_p3 = scmp.ne.s32.totalorder %s21_s16, %s198_s26  ;;  %p204_p5 = scmp.lt.s32.totalorder %s198_s26, %s198_s26 }
   0xe   :  { %p205_p6 = por %p204_p5, %p203_p4 }
  0x10   :  { %p206_p7 = pnand %p205_p6, %p199_p3 }
  0x12   :  { %209 = shalt.err (!%p206_p7)
}
  0x13   :  { %23 = dma.hbm_to_vmem [thread:$0]  %s369_s0, 32, %s21_s16, [#allocation3]  }
  0x14   :  { %s210_s5 = scalar_lea.hbm %s370_s1, 128 }
  0x15   :  { %p211_p8 = scmp.ne.s32.totalorder %s370_s1, %s210_s5  ;;  %p214_p9 = scmp.lt.u32.totalorder %s210_s5, %s370_s1 }
  0x17   :  { %p216_p10 = pnand %p214_p9, %p211_p8 }
  0x19   :  { %219 = shalt.err (!%p216_p10)
}
  0x1a   :  { %s220_s10 = scalar_lea.vmem %s31_s18, 128  ;;  %p225_p12 = scmp.lt.s32.totalorder %s31_s18, %s31_s18 }
  0x1b   :  { %p221_p11 = scmp.ne.s32.totalorder %s31_s18, %s220_s10  ;;  %p226_p13 = scmp.lt.s32.totalorder %s220_s10, %s220_s10 }
  0x1d   :  { %p227_p0 = por %p226_p13, %p225_p12 }
  0x1f   :  { %p228_p1 = pnand %p227_p0, %p221_p11 }
  0x21   :  { %231 = shalt.err (!%p228_p1)
}
  0x22   :  { %33 = dma.hbm_to_vmem [thread:$0]  %s370_s1, 128, %s31_s18, [#allocation6]  }
  0x23   :  { %276 = dma.done.wait [#allocation3], 32  }
  0x24   :  { %277 = vsyncadd [#allocation3], 4294967264 }
  0x25   :  { %278 = dma.done.wait [#allocation6], 128  }
  0x26   :  { %279 = vsyncadd [#allocation6], 4294967168  ;;  %v286_v0 = vmov 0.0   ;;  %vm287_vm0 = vmmov 0   ;;  %vm45_vm1 = vcmask 261120   ;;  %v43_v1 = vld [vmem:[#allocation5] sm:$0xff] }
  0x27   :  { %176 = vmatprep.subr.mxu0 %v286_v0  ;;  %178 = vmatprep.mubr.msk.f32.mxu0 %vm287_vm0, %v286_v0  ;;  %v42_v2 = vld [vmem:[#allocation2] sm:$0x3]  ;;  %s288_s1 = smov [#allocation7]   ;;  %vm134_vm3 = vcmask 25600   ;;  %s289_s15 = smov 124  }
  0x28   :  { %177 = vmatpush3.xpose.msk.msra.mxu0 %vm45_vm1, %v43_v1  ;;  %v173_v3 = vld [vmem:[%s371_s2] ss:$0 sm:$0xff]  ;;  %s147_s14 = sshll.u32 %s288_s1, 4  ;;  %s148_s14 = int_to_ptr.vmem [resolvable:$true] %s147_s14 }
  0x29   :  { %s232_s16 = scalar_lea.vmem %s148_s14, 32  ;;  %p237_p3 = scmp.lt.s32.totalorder %s148_s14, %s148_s14 }
  0x2a   :  { %p233_p2 = scmp.ne.s32.totalorder %s148_s14, %s232_s16  ;;  %p238_p4 = scmp.lt.s32.totalorder %s232_s16, %s232_s16 }
  0x2b   :  { %179 = vmatmul.mubr.msk.f32.vlgmr.msra.gmra.mrb[0].mxu0 %vm45_vm1, %v42_v2 }
  0x2c   :  { %p239_p5 = por %p238_p4, %p237_p3 }
  0x2e   :  { %p240_p6 = pnand %p239_p5, %p233_p2 }
  0xfe   :  { %v118_v4 = vpop.f32.mrb[0].mxu0 }
  0xff   :  { %v122_v5 = vmul.f32 0.17677669, %v118_v4  ;;  %v180_v6 = vpop.f32.mrb[1].mxu0 }
 0x101   :  { %v129_v7 = vadd.f32 %v173_v3, %v122_v5 }
 0x103   :  { %vm130_vm2 = vcmp.ge.f32.partialorder %v129_v7, 0.0  ;;  %v131_v8 = vmul.f32 0.2, %v129_v7 }
 0x105   :  { %v132_v9 = vsel %vm130_vm2, %v129_v7, %v131_v8 }
 0x106   :  { %v133_v10 = vadd.f32 1.0, %v132_v9  ;;  %137 = vrot.lane.b32.xlu0 %v132_v9, %s289_s15 }
 0x108   :  { %135 = vst.msk [vmem:[#allocation7] sm:$0x3] %vm134_vm3, %v133_v10 }
 0x109   :  { %243 = shalt.err (!%p240_p6)
}
 0x10a   :  { %s244_s18 = scalar_lea.hbm %s372_s3, 32 }
 0x10b   :  { %p245_p7 = scmp.ne.s32.totalorder %s372_s3, %s244_s18  ;;  %p248_p8 = scmp.lt.u32.totalorder %s244_s18, %s372_s3 }
 0x10d   :  { %p250_p9 = pnand %p248_p8, %p245_p7 }
 0x10f   :  { %253 = shalt.err (!%p250_p9)
}
 0x110   :  { %150 = dma.vmem_to_hbm [thread:$0]  %s148_s14, 32, %s372_s3, [#allocation4]  }
 0x111   :  { %s290_s25 = smov [#allocation8]  }
 0x112   :  { %s157_s26 = sshll.u32 %s290_s25, 4  ;;  %s158_s26 = int_to_ptr.vmem [resolvable:$true] %s157_s26 }
 0x113   :  { %s254_s27 = scalar_lea.vmem %s158_s26, 32  ;;  %p259_p11 = scmp.lt.s32.totalorder %s158_s26, %s158_s26 }
 0x114   :  { %p255_p10 = scmp.ne.s32.totalorder %s158_s26, %s254_s27  ;;  %p260_p12 = scmp.lt.s32.totalorder %s254_s27, %s254_s27 }
 0x116   :  { %p261_p13 = por %p260_p12, %p259_p11 }
 0x118   :  { %p262_p0 = pnand %p261_p13, %p255_p10 }
 0x178   :  { %v138_v11 = vpop.permute.xlu0 %137 }
 0x179   :  { %140 = vst.msk [vmem:[#allocation8] sm:$0x3] %vm134_vm3, %v138_v11 }
 0x17a   :  { %265 = shalt.err (!%p262_p0)
}
 0x17b   :  { %s266_s30 = scalar_lea.hbm %s373_s4, 32 }
 0x17c   :  { %p267_p1 = scmp.ne.s32.totalorder %s373_s4, %s266_s30  ;;  %p270_p2 = scmp.lt.u32.totalorder %s266_s30, %s373_s4 }
 0x17e   :  { %p272_p3 = pnand %p270_p2, %p267_p1 }
 0x180   :  { %275 = shalt.err (!%p272_p3)
}
 0x181   :  { %160 = dma.vmem_to_hbm [thread:$0]  %s158_s26, 32, %s373_s4, [#allocation9]  }
 0x182   :  { %280 = dma.done.wait [#allocation4], 32  }
 0x183   :  { %281 = vsyncadd [#allocation4], 4294967264 }
 0x184   :  { %282 = dma.done.wait [#allocation9], 32  }
 0x185   :  { %283 = vsyncadd [#allocation9], 4294967264 }
 0x186   :  { %167 = vsyncpa [#allocation3], 1 }
 0x187   :  { %168 = vsyncpa [#allocation6], 1 }
 0x188   :  { %169 = vsyncpa [#allocation4], 1 }
 0x189   :  { %170 = vsyncpa [#allocation9], 1 }

</bundles_post_ra>
